<compile_context>
chip_gen: v6e
topology: v6e:2x2x1
jax: 0.10.0
libtpu: 0.0.40
codegen_flags: <defaults>
</compile_context>

<pallas_src>
import jax
import jax.numpy as jnp
from jax.experimental import pallas as pl
from jax.experimental.pallas import tpu as pltpu

# ---- hyperparameters (stand-ins for the argparse args in the original) ----
EMB_DIM = 300            # TEXT.vocab.vectors.size(1) (GloVe-style)
N_FIELD = 3              # n = receptive_field
HIDDEN = 64              # hidden_size
VOCAB = 256              # len(TEXT.vocab) (small synthetic vocab)
DROPOUT_P = 0.5          # dropout_rate
EMB_MAX_NORM = 5.0       # embedding_max_norm

D_IN = N_FIELD * EMB_DIM     # 900
D_PAD = 1024                 # lane-dense pad of D_IN
H_PAD = 128                  # lane-dense pad of HIDDEN
TB = 8                       # batch tile (sublane multiple)
INV_KEEP = 1.0 / (1.0 - DROPOUT_P)


def nnlm_kernel(x_ref, mx_ref, mh_ref, wh_ref, bh_ref, wu_ref, ww_ref,
                b_ref, o_ref):
    x = x_ref[...]                                          # (TB, D_PAD) bf16
    # hidden layer: tanh(x @ Wh + bh); MXU in bf16, f32 accumulate,
    # elementwise math kept in f32 (no bf16 VPU/EUP on v5e).
    h = jnp.tanh(
        jnp.dot(x, wh_ref[...], preferred_element_type=jnp.float32)
        + bh_ref[...])                                      # (TB, H_PAD) f32
    # inverted dropout: masks are 0/1 (exact in bf16); the 1/(1-p) scale is
    # hoisted and applied once to the summed matmul result below.
    h_d = h.astype(jnp.bfloat16) * mh_ref[...]              # F.dropout(out)
    x_d = x * mx_ref[...]                                   # F.dropout(embeds)
    acc = jnp.dot(h_d, wu_ref[...], preferred_element_type=jnp.float32)
    acc = acc + jnp.dot(x_d, ww_ref[...],
                        preferred_element_type=jnp.float32)
    o_ref[...] = (acc * INV_KEEP + b_ref[...]).astype(o_ref.dtype)


@jax.jit
def nnlm_forward(inputs, emb_table, wh, bh, wu, ww, b_sum, key):
    """inputs: (B, n) int32 token ids; key: dropout PRNG key."""
    B = inputs.shape[0]

    # --- glue: embedding lookup with max_norm (as nn.Embedding(max_norm=)) ---
    g = jnp.take(emb_table, inputs, axis=0)                 # (B, n, 300)
    norms = jnp.sqrt(jnp.sum(g * g, axis=-1, keepdims=True))
    g = g * jnp.minimum(1.0, EMB_MAX_NORM / jnp.maximum(norms, 1e-7))
    x = g.reshape(B, D_IN)                                  # view(-1, n*300)

    # pad batch to the tile and features to the lane-dense width; cast to bf16
    Bp = pl.cdiv(B, TB) * TB
    x = jnp.pad(x, ((0, Bp - B), (0, D_PAD - D_IN))).astype(jnp.bfloat16)

    kx, kh = jax.random.split(key)
    mx = jax.random.bernoulli(kx, 1.0 - DROPOUT_P,
                              (Bp, D_PAD)).astype(jnp.bfloat16)
    mh = jax.random.bernoulli(kh, 1.0 - DROPOUT_P,
                              (Bp, H_PAD)).astype(jnp.bfloat16)

    row = lambda i: (i, 0)     # batch-tiled operands
    rep = lambda i: (0, 0)     # weights / biases stay VMEM-resident

    out = pl.pallas_call(
        nnlm_kernel,
        out_shape=jax.ShapeDtypeStruct((Bp, VOCAB), jnp.float32),
        grid=(Bp // TB,),
        in_specs=[
            pl.BlockSpec((TB, D_PAD), row),        # x
            pl.BlockSpec((TB, D_PAD), row),        # dropout mask (embeds)
            pl.BlockSpec((TB, H_PAD), row),        # dropout mask (hidden)
            pl.BlockSpec((D_PAD, H_PAD), rep),     # wh
            pl.BlockSpec((1, H_PAD), rep),         # bh
            pl.BlockSpec((H_PAD, VOCAB), rep),     # wu
            pl.BlockSpec((D_PAD, VOCAB), rep),     # ww
            pl.BlockSpec((1, VOCAB), rep),         # bu + bw
        ],
        out_specs=pl.BlockSpec((TB, VOCAB), row),
        compiler_params=pltpu.CompilerParams(
            dimension_semantics=("parallel",)),
    )(x, mx, mh, wh, bh, wu, ww, b_sum)
    return out[:B]


def init_params(key):
    """Deterministic parameter init matching the module's shapes."""
    ks = jax.random.split(key, 7)
    emb_table = jax.random.normal(ks[0], (VOCAB, EMB_DIM), jnp.float32)
    # nn.Linear(in, out) stores weight (out, in); we pre-transpose to
    # (in, out), zero-pad to lane-dense shapes, and cast matmul weights bf16.
    wh = jax.random.normal(ks[1], (D_IN, HIDDEN), jnp.float32) * 0.02
    bh = jax.random.normal(ks[2], (1, HIDDEN), jnp.float32) * 0.02
    wu = jax.random.normal(ks[3], (HIDDEN, VOCAB), jnp.float32) * 0.02
    bu = jax.random.normal(ks[4], (1, VOCAB), jnp.float32) * 0.02
    ww = jax.random.normal(ks[5], (D_IN, VOCAB), jnp.float32) * 0.02
    bw = jax.random.normal(ks[6], (1, VOCAB), jnp.float32) * 0.02

    wh_p = (jnp.zeros((D_PAD, H_PAD), jnp.float32)
            .at[:D_IN, :HIDDEN].set(wh).astype(jnp.bfloat16))
    bh_p = jnp.zeros((1, H_PAD), jnp.float32).at[:, :HIDDEN].set(bh)
    wu_p = (jnp.zeros((H_PAD, VOCAB), jnp.float32)
            .at[:HIDDEN, :].set(wu).astype(jnp.bfloat16))
    ww_p = (jnp.zeros((D_PAD, VOCAB), jnp.float32)
            .at[:D_IN, :].set(ww).astype(jnp.bfloat16))
    b_sum = bu + bw
    return emb_table, wh_p, bh_p, wu_p, ww_p, b_sum


if __name__ == "__main__":
    key = jax.random.PRNGKey(0)
    k_params, k_tokens, k_drop = jax.random.split(key, 3)
    params = init_params(k_params)

    B = 8
    inputs = jax.random.randint(k_tokens, (B, N_FIELD), 0, VOCAB, jnp.int32)

    out = nnlm_forward(inputs, *params, k_drop)
    jax.block_until_ready(out)
    assert out.shape == (B, VOCAB) and out.dtype == jnp.float32
    print("KERNEL_OK")
</pallas_src>

<mosaic_0001>
module attributes {stable_mosaic.version = 11 : i64} {
  func.func @nnlm_kernel(%arg0: i32, %arg1: memref<8x1024xbf16, #tpu.memory_space<vmem>>, %arg2: memref<8x1024xbf16, #tpu.memory_space<vmem>>, %arg3: memref<8x128xbf16, #tpu.memory_space<vmem>>, %arg4: memref<1024x128xbf16, #tpu.memory_space<vmem>>, %arg5: memref<1x128xf32, #tpu.memory_space<vmem>>, %arg6: memref<128x256xbf16, #tpu.memory_space<vmem>>, %arg7: memref<1024x256xbf16, #tpu.memory_space<vmem>>, %arg8: memref<1x256xf32, #tpu.memory_space<vmem>>, %arg9: memref<8x256xf32, #tpu.memory_space<vmem>>) attributes {dimension_semantics = [#tpu.dimension_semantics<parallel>], iteration_bounds = array<i64: 1>, scalar_prefetch = 0 : i64, scratch_operands = 0 : i64, tpu.core_type = #tpu.core_type<tc>, window_params = [{transform_indices = @transform_0, window_bounds = array<i64: 8, 1024>}, {transform_indices = @transform_1, window_bounds = array<i64: 8, 1024>}, {transform_indices = @transform_2, window_bounds = array<i64: 8, 128>}, {pipeline_mode = #tpu.pipeline_mode<synchronous>, transform_indices = @transform_3, window_bounds = array<i64: 1024, 128>}, {pipeline_mode = #tpu.pipeline_mode<synchronous>, transform_indices = @transform_4, window_bounds = array<i64: 1, 128>}, {pipeline_mode = #tpu.pipeline_mode<synchronous>, transform_indices = @transform_5, window_bounds = array<i64: 128, 256>}, {pipeline_mode = #tpu.pipeline_mode<synchronous>, transform_indices = @transform_6, window_bounds = array<i64: 1024, 256>}, {pipeline_mode = #tpu.pipeline_mode<synchronous>, transform_indices = @transform_7, window_bounds = array<i64: 1, 256>}, {transform_indices = @transform_8, window_bounds = array<i64: 8, 256>}]} {
    %c0 = arith.constant 0 : index
    %c0_0 = arith.constant 0 : index
    %0 = vector.load %arg1[%c0, %c0_0] : memref<8x1024xbf16, #tpu.memory_space<vmem>>, vector<8x1024xbf16>
    %c0_1 = arith.constant 0 : index
    %c0_2 = arith.constant 0 : index
    %1 = vector.load %arg4[%c0_1, %c0_2] : memref<1024x128xbf16, #tpu.memory_space<vmem>>, vector<1024x128xbf16>
    %cst = arith.constant dense<0.000000e+00> : vector<8x128xf32>
    %2 = tpu.matmul %0, %1, %cst {dimension_numbers = #tpu.dot_dimension_numbers<[1], [0], [0], [1], [0, 0, 1, 1], [], []>} : vector<8x1024xbf16>, vector<1024x128xbf16>, vector<8x128xf32> -> vector<8x128xf32>
    %c0_3 = arith.constant 0 : index
    %c0_4 = arith.constant 0 : index
    %3 = vector.load %arg5[%c0_3, %c0_4] : memref<1x128xf32, #tpu.memory_space<vmem>>, vector<1x128xf32>
    %4 = vector.broadcast %3 : vector<1x128xf32> to vector<8x128xf32>
    %5 = arith.addf %2, %4 : vector<8x128xf32>
    %6 = math.tanh %5 : vector<8x128xf32>
    %7 = arith.truncf %6 : vector<8x128xf32> to vector<8x128xbf16>
    %c0_5 = arith.constant 0 : index
    %c0_6 = arith.constant 0 : index
    %8 = vector.load %arg3[%c0_5, %c0_6] : memref<8x128xbf16, #tpu.memory_space<vmem>>, vector<8x128xbf16>
    %9 = arith.mulf %7, %8 : vector<8x128xbf16>
    %c0_7 = arith.constant 0 : index
    %c0_8 = arith.constant 0 : index
    %10 = vector.load %arg2[%c0_7, %c0_8] : memref<8x1024xbf16, #tpu.memory_space<vmem>>, vector<8x1024xbf16>
    %11 = arith.mulf %0, %10 : vector<8x1024xbf16>
    %c0_9 = arith.constant 0 : index
    %c0_10 = arith.constant 0 : index
    %12 = vector.load %arg6[%c0_9, %c0_10] : memref<128x256xbf16, #tpu.memory_space<vmem>>, vector<128x256xbf16>
    %cst_11 = arith.constant dense<0.000000e+00> : vector<8x256xf32>
    %13 = tpu.matmul %9, %12, %cst_11 {dimension_numbers = #tpu.dot_dimension_numbers<[1], [0], [0], [1], [0, 0, 1, 1], [], []>} : vector<8x128xbf16>, vector<128x256xbf16>, vector<8x256xf32> -> vector<8x256xf32>
    %c0_12 = arith.constant 0 : index
    %c0_13 = arith.constant 0 : index
    %14 = vector.load %arg7[%c0_12, %c0_13] : memref<1024x256xbf16, #tpu.memory_space<vmem>>, vector<1024x256xbf16>
    %cst_14 = arith.constant dense<0.000000e+00> : vector<8x256xf32>
    %15 = tpu.matmul %11, %14, %cst_14 {dimension_numbers = #tpu.dot_dimension_numbers<[1], [0], [0], [1], [0, 0, 1, 1], [], []>} : vector<8x1024xbf16>, vector<1024x256xbf16>, vector<8x256xf32> -> vector<8x256xf32>
    %16 = arith.addf %13, %15 : vector<8x256xf32>
    %cst_15 = arith.constant 2.000000e+00 : f32
    %17 = vector.broadcast %cst_15 : f32 to vector<8x256xf32>
    %18 = arith.mulf %16, %17 : vector<8x256xf32>
    %c0_16 = arith.constant 0 : index
    %c0_17 = arith.constant 0 : index
    %19 = vector.load %arg8[%c0_16, %c0_17] : memref<1x256xf32, #tpu.memory_space<vmem>>, vector<1x256xf32>
    %20 = vector.broadcast %19 : vector<1x256xf32> to vector<8x256xf32>
    %21 = arith.addf %18, %20 : vector<8x256xf32>
    %c0_18 = arith.constant 0 : index
    %c0_19 = arith.constant 0 : index
    %22 = vector.load %arg9[%c0_18, %c0_19] : memref<8x256xf32, #tpu.memory_space<vmem>>, vector<8x256xf32>
    tpu.vector_store %arg9[%c0_18, %c0_19], %21 {strides = array<i32>} : memref<8x256xf32, #tpu.memory_space<vmem>>, vector<8x256xf32>,
    return
  }
  func.func @transform_0(%arg0: i32) -> (i32, i32) {
    %c0_i32 = arith.constant 0 : i32
    %c0_i32_0 = arith.constant 0 : i32
    return %arg0, %c0_i32 : i32, i32
  }
  func.func @transform_1(%arg0: i32) -> (i32, i32) {
    %c0_i32 = arith.constant 0 : i32
    %c0_i32_0 = arith.constant 0 : i32
    return %arg0, %c0_i32 : i32, i32
  }
  func.func @transform_2(%arg0: i32) -> (i32, i32) {
    %c0_i32 = arith.constant 0 : i32
    %c0_i32_0 = arith.constant 0 : i32
    return %arg0, %c0_i32 : i32, i32
  }
  func.func @transform_3(%arg0: i32) -> (i32, i32) {
    %c0_i32 = arith.constant 0 : i32
    %c0_i32_0 = arith.constant 0 : i32
    %c0_i32_1 = arith.constant 0 : i32
    return %c0_i32, %c0_i32_0 : i32, i32
  }
  func.func @transform_4(%arg0: i32) -> (i32, i32) {
    %c0_i32 = arith.constant 0 : i32
    %c0_i32_0 = arith.constant 0 : i32
    %c0_i32_1 = arith.constant 0 : i32
    return %c0_i32, %c0_i32_0 : i32, i32
  }
  func.func @transform_5(%arg0: i32) -> (i32, i32) {
    %c0_i32 = arith.constant 0 : i32
    %c0_i32_0 = arith.constant 0 : i32
    %c0_i32_1 = arith.constant 0 : i32
    return %c0_i32, %c0_i32_0 : i32, i32
  }
  func.func @transform_6(%arg0: i32) -> (i32, i32) {
    %c0_i32 = arith.constant 0 : i32
    %c0_i32_0 = arith.constant 0 : i32
    %c0_i32_1 = arith.constant 0 : i32
    return %c0_i32, %c0_i32_0 : i32, i32
  }
  func.func @transform_7(%arg0: i32) -> (i32, i32) {
    %c0_i32 = arith.constant 0 : i32
    %c0_i32_0 = arith.constant 0 : i32
    %c0_i32_1 = arith.constant 0 : i32
    return %c0_i32, %c0_i32_0 : i32, i32
  }
  func.func @transform_8(%arg0: i32) -> (i32, i32) {
    %c0_i32 = arith.constant 0 : i32
    %c0_i32_0 = arith.constant 0 : i32
    return %arg0, %c0_i32 : i32, i32
  }
}

</mosaic_0001>

<bundles_post_ra>
// kernel: nnlm_forward.1
= control target key start
LH: loop header
LB: loop body
LE: loop exit
PB: predicated region body
PF: predicated region fallthrough
CT: control target
= control target key end

     0   :  { %s3269_s0 = inlined_call_operand.vmem [shape: bf16[8,1024], index: 0, kind: input, shape index: {}]   ;;  %s3270_s1 = inlined_call_operand.vmem [shape: bf16[8,1024], index: 1, kind: input, shape index: {}]   ;;  %s3271_s2 = inlined_call_operand.vmem [shape: bf16[8,128], index: 2, kind: input, shape index: {}]   ;;  %s3272_s3 = inlined_call_operand.vmem [shape: bf16[1024,128], index: 3, kind: input, shape index: {}]   ;;  %s3273_s4 = inlined_call_operand.vmem [shape: f32[1,128], index: 4, kind: input, shape index: {}]   ;;  %s3274_s5 = inlined_call_operand.vmem [shape: bf16[128,256], index: 5, kind: input, shape index: {}]   ;;  %s3275_s6 = inlined_call_operand.vmem [shape: bf16[1024,256], index: 6, kind: input, shape index: {}]   ;;  %s3276_s7 = inlined_call_operand.vmem [shape: f32[1,256], index: 7, kind: input, shape index: {}]   ;;  %s3277_s8 = inlined_call_operand.hbm [shape: f32[8,256], index: 8, kind: output, shape index: {}]  }
   0x1   :  { %v2198_v0 = vld [vmem:[%s3272_s3 + $0x78] sm:$0xff]   ;;  %v2202_v4 = vld [vmem:[%s3272_s3 + $0x70] sm:$0xff]   ;;  %v2206_v8 = vld [vmem:[%s3272_s3 + $0x68] sm:$0xff]  }
   0x2   :  { %v2199_v1 = vld [vmem:[%s3272_s3 + $0xf8] sm:$0xff]   ;;  %2108 = vmatprep.subr.bf16.mxu0 %v2198_v0  ;;  %v2203_v5 = vld [vmem:[%s3272_s3 + $0xf0] sm:$0xff]   ;;  %v2207_v9 = vld [vmem:[%s3272_s3 + $0xe8] sm:$0xff]  }
   0x3   :  { %v2200_v2 = vld [vmem:[%s3272_s3 + $0x38] sm:$0xff]   ;;  %2130 = vmatprep.subr.bf16.mxu1 %v2199_v1  ;;  %v2204_v6 = vld [vmem:[%s3272_s3 + $0x30] sm:$0xff]   ;;  %v2208_v10 = vld [vmem:[%s3272_s3 + $0x28] sm:$0xff]  }
   0x4   :  { %v2201_v3 = vld [vmem:[%s3272_s3 + $0xb8] sm:$0xff]   ;;  %2109 = vmatpush3.bf16.msra.mxu0 %v2200_v2  ;;  %v2205_v7 = vld [vmem:[%s3272_s3 + $0xb0] sm:$0xff]   ;;  %v2209_v11 = vld [vmem:[%s3272_s3 + $0xa8] sm:$0xff]  }
   0x5   :  { %2131 = vmatpush3.bf16.msra.mxu1 %v2201_v3  ;;  %2110 = vmatprep.subr.bf16.mxu0 %v2202_v4  ;;  %v2210_v12 = vld [vmem:[%s3272_s3 + $0x60] sm:$0xff]   ;;  %v2214_v16 = vld [vmem:[%s3272_s3 + $0x58] sm:$0xff]   ;;  %v2218_v20 = vld [vmem:[%s3272_s3 + $0x50] sm:$0xff]  }
   0x6   :  { %2132 = vmatprep.subr.bf16.mxu1 %v2203_v5  ;;  %v2211_v13 = vld [vmem:[%s3272_s3 + $0xe0] sm:$0xff]   ;;  %v2215_v17 = vld [vmem:[%s3272_s3 + $0xd8] sm:$0xff]   ;;  %v2219_v21 = vld [vmem:[%s3272_s3 + $0xd0] sm:$0xff]  }
   0x7   :  { %v2212_v14 = vld [vmem:[%s3272_s3 + $0x20] sm:$0xff]   ;;  %v2216_v18 = vld [vmem:[%s3272_s3 + $0x18] sm:$0xff]   ;;  %v2220_v22 = vld [vmem:[%s3272_s3 + $0x10] sm:$0xff]  }
   0x8   :  { %2111 = vmatpush3.bf16.msra.mxu0 %v2204_v6  ;;  %v2213_v15 = vld [vmem:[%s3272_s3 + $0xa0] sm:$0xff]   ;;  %v2217_v19 = vld [vmem:[%s3272_s3 + $0x98] sm:$0xff]   ;;  %v2221_v23 = vld [vmem:[%s3272_s3 + $0x90] sm:$0xff]  }
   0x9   :  { %2133 = vmatpush3.bf16.msra.mxu1 %v2205_v7  ;;  %2112 = vmatprep.subr.bf16.mxu0 %v2206_v8  ;;  %v2222_v24 = vld [vmem:[%s3272_s3 + $0x48] sm:$0xff]   ;;  %v2226_v28 = vld [vmem:[%s3272_s3 + $0x40] sm:$0xff]   ;;  %v2234_v38 = vld [vmem:[%s3272_s3 + $0x178] sm:$0xff]  }
   0xa   :  { %2134 = vmatprep.subr.bf16.mxu1 %v2207_v9  ;;  %v2223_v25 = vld [vmem:[%s3272_s3 + $0xc8] sm:$0xff]   ;;  %v2227_v29 = vld [vmem:[%s3272_s3 + $0xc0] sm:$0xff]   ;;  %v2235_v39 = vld [vmem:[%s3272_s3 + $0x1f8] sm:$0xff]  }
   0xb   :  { %v2224_v26 = vld [vmem:[%s3272_s3 + $0x8] sm:$0xff]   ;;  %v2228_v30 = vld [vmem:[%s3272_s3] sm:$0xff]   ;;  %v2236_v40 = vld [vmem:[%s3272_s3 + $0x138] sm:$0xff]  }
   0xc   :  { %2113 = vmatpush3.bf16.msra.mxu0 %v2208_v10  ;;  %v2225_v27 = vld [vmem:[%s3272_s3 + $0x88] sm:$0xff]   ;;  %v2229_v31 = vld [vmem:[%s3272_s3 + $0x80] sm:$0xff]   ;;  %v2237_v41 = vld [vmem:[%s3272_s3 + $0x1b8] sm:$0xff]  }
   0xd   :  { %2135 = vmatpush3.bf16.msra.mxu1 %v2209_v11  ;;  %2114 = vmatprep.subr.bf16.mxu0 %v2210_v12  ;;  %v2656_v32 = vld [vmem:[%s3269_s0] sm:$0xff]  ;;  %v2661_v33 = vld [vmem:[%s3269_s0 + $0x8] sm:$0xff]  ;;  %v2238_v42 = vld [vmem:[%s3272_s3 + $0x170] sm:$0xff]  }
   0xe   :  { %2136 = vmatprep.subr.bf16.mxu1 %v2211_v13  ;;  %v1885_v34 = vcombine.high %v2656_v32, %v2656_v32  ;;  %v1887_v35 = vcombine.high %v2661_v33, %v2661_v33  ;;  %v1884_v36 = vcombine.low %v2656_v32, %v2656_v32  ;;  %v1886_v37 = vcombine.low %v2661_v33, %v2661_v33  ;;  %v2239_v43 = vld [vmem:[%s3272_s3 + $0x1f0] sm:$0xff]   ;;  %v2242_v46 = vld [vmem:[%s3272_s3 + $0x168] sm:$0xff]   ;;  %v2246_v50 = vld [vmem:[%s3272_s3 + $0x160] sm:$0xff]  }
   0xf   :  { %v2240_v44 = vld [vmem:[%s3272_s3 + $0x130] sm:$0xff]   ;;  %v2243_v47 = vld [vmem:[%s3272_s3 + $0x1e8] sm:$0xff]   ;;  %v2247_v51 = vld [vmem:[%s3272_s3 + $0x1e0] sm:$0xff]  }
  0x10   :  { %2115 = vmatpush3.bf16.msra.mxu0 %v2212_v14  ;;  %614 = vmatprep.mubr.bf16.mxu0 %v1885_v34  ;;  %v2241_v45 = vld [vmem:[%s3272_s3 + $0x1b0] sm:$0xff]   ;;  %v2244_v48 = vld [vmem:[%s3272_s3 + $0x128] sm:$0xff]   ;;  %v2248_v52 = vld [vmem:[%s3272_s3 + $0x120] sm:$0xff]  }
  0x11   :  { %2137 = vmatpush3.bf16.msra.mxu1 %v2213_v15  ;;  %2116 = vmatprep.subr.bf16.mxu0 %v2214_v16  ;;  %v2245_v49 = vld [vmem:[%s3272_s3 + $0x1a8] sm:$0xff]   ;;  %v2249_v53 = vld [vmem:[%s3272_s3 + $0x1a0] sm:$0xff]   ;;  %v2250_v54 = vld [vmem:[%s3272_s3 + $0x158] sm:$0xff]  }
  0x12   :  { %2138 = vmatprep.subr.bf16.mxu1 %v2215_v17  ;;  %654 = vmatprep.mubr.bf16.mxu1 %v1887_v35  ;;  %v2251_v55 = vld [vmem:[%s3272_s3 + $0x1d8] sm:$0xff]   ;;  %v2254_v58 = vld [vmem:[%s3272_s3 + $0x150] sm:$0xff]   ;;  %v2258_v62 = vld [vmem:[%s3272_s3 + $0x148] sm:$0xff]  }
  0x13   :  { %v2252_v56 = vld [vmem:[%s3272_s3 + $0x118] sm:$0xff]   ;;  %v2255_v59 = vld [vmem:[%s3272_s3 + $0x1d0] sm:$0xff]   ;;  %v746_v63 = vld [vmem:[%s3270_s1] sm:$0xff] }
  0x14   :  { %2117 = vmatpush3.bf16.msra.mxu0 %v2216_v18  ;;  %v2253_v57 = vld [vmem:[%s3272_s3 + $0x198] sm:$0xff]   ;;  %v2256_v60 = vld [vmem:[%s3272_s3 + $0x110] sm:$0xff]   ;;  %v2259_v0 = vld [vmem:[%s3272_s3 + $0x1c8] sm:$0xff]   ;;  %v2768_v6 = vmul.bf16 %v746_v63, %v2656_v32 }
  0x15   :  { %2139 = vmatpush3.bf16.msra.mxu1 %v2217_v19  ;;  %2118 = vmatprep.subr.bf16.mxu0 %v2218_v20  ;;  %v2257_v61 = vld [vmem:[%s3272_s3 + $0x190] sm:$0xff]   ;;  %v747_v1 = vld [vmem:[%s3270_s1 + $0x8] sm:$0xff]  ;;  %v2262_v4 = vld [vmem:[%s3272_s3 + $0x140] sm:$0xff]  }
  0x16   :  { %2140 = vmatprep.subr.bf16.mxu1 %v2219_v21  ;;  %v2260_v2 = vld [vmem:[%s3272_s3 + $0x108] sm:$0xff]   ;;  %v2263_v5 = vld [vmem:[%s3272_s3 + $0x1c0] sm:$0xff]   ;;  %v2774_v8 = vmul.bf16 %v747_v1, %v2661_v33  ;;  %v2782_v10 = vld [vmem:[%s3269_s0 + $0x10] sm:$0xff]  ;;  %v1957_v20 = vcombine.high %v2768_v6, %v2768_v6 }
  0x17   :  { %v2261_v3 = vld [vmem:[%s3272_s3 + $0x188] sm:$0xff]   ;;  %v2264_v7 = vld [vmem:[%s3272_s3 + $0x100] sm:$0xff]   ;;  %v2787_v11 = vld [vmem:[%s3269_s0 + $0x18] sm:$0xff]  ;;  %v1889_v12 = vcombine.high %v2782_v10, %v2782_v10  ;;  %v1888_v14 = vcombine.low %v2782_v10, %v2782_v10 }
  0x18   :  { %2119 = vmatpush3.bf16.msra.mxu0 %v2220_v22  ;;  %v2265_v9 = vld [vmem:[%s3272_s3 + $0x180] sm:$0xff]   ;;  %v1891_v13 = vcombine.high %v2787_v11, %v2787_v11  ;;  %v1890_v15 = vcombine.low %v2787_v11, %v2787_v11  ;;  %v2270_v16 = vld [vmem:[%s3275_s6 + $0x70] ss:$8 sps:$4 sm:$0xff]   ;;  %v2272_v17 = vld [vmem:[%s3275_s6 + $0x74] ss:$8 sps:$4 sm:$0xff]   ;;  %v1959_v22 = vcombine.high %v2774_v8, %v2774_v8 }
  0x19   :  { %2141 = vmatpush3.bf16.msra.mxu1 %v2221_v23  ;;  %2120 = vmatprep.subr.bf16.mxu0 %v2222_v24  ;;  %v2273_v18 = vld [vmem:[%s3275_s6 + $0x170] ss:$8 sps:$4 sm:$0xff]   ;;  %v2275_v19 = vld [vmem:[%s3275_s6 + $0x174] ss:$8 sps:$4 sm:$0xff]   ;;  %v2278_v21 = vld [vmem:[%s3275_s6 + $0x64] ss:$8 sps:$4 sm:$0xff]  }
  0x1a   :  { %2142 = vmatprep.subr.bf16.mxu1 %v2223_v25  ;;  %v2276_v23 = vld [vmem:[%s3275_s6 + $0x60] ss:$8 sps:$4 sm:$0xff]   ;;  %v2281_v24 = vld [vmem:[%s3275_s6 + $0x164] ss:$8 sps:$4 sm:$0xff]   ;;  %v2296_v33 = vld [vmem:[%s3275_s6 + $0x34] ss:$8 sps:$4 sm:$0xff]  }
  0x1b   :  { %v2279_v25 = vld [vmem:[%s3275_s6 + $0x160] ss:$8 sps:$4 sm:$0xff]   ;;  %v2299_v35 = vld [vmem:[%s3275_s6 + $0x134] ss:$8 sps:$4 sm:$0xff]   ;;  %v2341_v63 = vld [vmem:[%s3275_s6 + $0x1c4] ss:$8 sps:$4 sm:$0xff]  }
  0x1c   :  { %2121 = vmatpush3.bf16.msra.mxu0 %v2224_v26  ;;  %v2284_v26 = vld [vmem:[%s3275_s6 + $0x54] ss:$8 sps:$4 sm:$0xff]   ;;  %v2288_v32 = vld [vmem:[%s3275_s6 + $0x40] ss:$8 sps:$4 sm:$0xff]  }
  0x1d   :  { %2143 = vmatpush3.bf16.msra.mxu1 %v2225_v27  ;;  %2122 = vmatprep.subr.bf16.mxu0 %v2226_v28  ;;  %v2287_v27 = vld [vmem:[%s3275_s6 + $0x154] ss:$8 sps:$4 sm:$0xff]   ;;  %v2282_v28 = vld [vmem:[%s3275_s6 + $0x50] ss:$8 sps:$4 sm:$0xff]   ;;  %v2291_v34 = vld [vmem:[%s3275_s6 + $0x140] ss:$8 sps:$4 sm:$0xff]  }
  0x1e   :  { %2144 = vmatprep.subr.bf16.mxu1 %v2227_v29  ;;  %v2290_v29 = vld [vmem:[%s3275_s6 + $0x44] ss:$8 sps:$4 sm:$0xff]   ;;  %v2344_v1 = vld [vmem:[%s3275_s6 + $0xb4] ss:$8 sps:$4 sm:$0xff]  }
  0x20   :  { %2123 = vmatpush3.bf16.msra.mxu0 %v2228_v30  ;;  %v2285_v30 = vld [vmem:[%s3275_s6 + $0x150] ss:$8 sps:$4 sm:$0xff]  }
  0x21   :  { %2145 = vmatpush3.bf16.msra.mxu1 %v2229_v31  ;;  %2152 = vmatprep.subr.bf16.mxu0 %v2234_v38  ;;  %v2293_v31 = vld [vmem:[%s3275_s6 + $0x144] ss:$8 sps:$4 sm:$0xff]   ;;  %v2297_v38 = vld [vmem:[%s3275_s6 + $0x130] ss:$8 sps:$4 sm:$0xff]  }
  0x22   :  { %2174 = vmatprep.subr.bf16.mxu1 %v2235_v39  ;;  %v2305_v39 = vld [vmem:[%s3275_s6 + $0x124] ss:$8 sps:$4 sm:$0xff]  }
  0x23   :  { %615 = vmatmul.mubr.bf16.vlgmr.msra.gmra.mxu0 %v1884_v36  ;;  %v2294_v36 = vld [vmem:[%s3275_s6 + $0x30] ss:$8 sps:$4 sm:$0xff]  }
  0x24   :  { %655 = vmatmul.mubr.bf16.vlgmr.msra.gmra.mxu1 %v1886_v37  ;;  %2153 = vmatpush3.bf16.msra.mxu0 %v2236_v40  ;;  %v2302_v37 = vld [vmem:[%s3275_s6 + $0x24] ss:$8 sps:$4 sm:$0xff]   ;;  %v2300_v40 = vld [vmem:[%s3275_s6 + $0x20] ss:$8 sps:$4 sm:$0xff]  }
  0x25   :  { %2175 = vmatpush3.bf16.msra.mxu1 %v2237_v41  ;;  %2154 = vmatprep.subr.bf16.mxu0 %v2238_v42  ;;  %v2308_v41 = vld [vmem:[%s3275_s6 + $0x14] ss:$8 sps:$4 sm:$0xff]   ;;  %v2303_v42 = vld [vmem:[%s3275_s6 + $0x120] ss:$8 sps:$4 sm:$0xff]  }
  0x26   :  { %2176 = vmatprep.subr.bf16.mxu1 %v2239_v43  ;;  %694 = vmatprep.mubr.bf16.mxu0 %v1889_v12  ;;  %v2311_v43 = vld [vmem:[%s3275_s6 + $0x114] ss:$8 sps:$4 sm:$0xff]   ;;  %v2348_v12 = vld [vmem:[%s3275_s6 + $0xa0] ss:$8 sps:$4 sm:$0xff]  }
  0x27   :  { %734 = vmatprep.mubr.bf16.mxu1 %v1891_v13  ;;  %v2356_v13 = vld [vmem:[%s3275_s6 + $0x94] ss:$8 sps:$4 sm:$0xff]  }
  0x28   :  { %2155 = vmatpush3.bf16.msra.mxu0 %v2240_v44  ;;  %v2306_v44 = vld [vmem:[%s3275_s6 + $0x10] ss:$8 sps:$4 sm:$0xff]  }
  0x29   :  { %2177 = vmatpush3.bf16.msra.mxu1 %v2241_v45  ;;  %2156 = vmatprep.subr.bf16.mxu0 %v2242_v46  ;;  %v2314_v45 = vld [vmem:[%s3275_s6 + $0x4] ss:$8 sps:$4 sm:$0xff]   ;;  %v2309_v46 = vld [vmem:[%s3275_s6 + $0x110] ss:$8 sps:$4 sm:$0xff]  }
  0x2a   :  { %2178 = vmatprep.subr.bf16.mxu1 %v2243_v47  ;;  %v2317_v47 = vld [vmem:[%s3275_s6 + $0x104] ss:$8 sps:$4 sm:$0xff]  }
  0x2c   :  { %2157 = vmatpush3.bf16.msra.mxu0 %v2244_v48  ;;  %v2312_v48 = vld [vmem:[%s3275_s6] ss:$8 sps:$4 sm:$0xff]  }
  0x2d   :  { %2179 = vmatpush3.bf16.msra.mxu1 %v2245_v49  ;;  %2158 = vmatprep.subr.bf16.mxu0 %v2246_v50  ;;  %v2320_v49 = vld [vmem:[%s3275_s6 + $0xf4] ss:$8 sps:$4 sm:$0xff]   ;;  %v2315_v50 = vld [vmem:[%s3275_s6 + $0x100] ss:$8 sps:$4 sm:$0xff]  }
  0x2e   :  { %2180 = vmatprep.subr.bf16.mxu1 %v2247_v51  ;;  %v2323_v51 = vld [vmem:[%s3275_s6 + $0x1f4] ss:$8 sps:$4 sm:$0xff]  }
  0x30   :  { %2159 = vmatpush3.bf16.msra.mxu0 %v2248_v52  ;;  %v2318_v52 = vld [vmem:[%s3275_s6 + $0xf0] ss:$8 sps:$4 sm:$0xff]  }
  0x31   :  { %2181 = vmatpush3.bf16.msra.mxu1 %v2249_v53  ;;  %2160 = vmatprep.subr.bf16.mxu0 %v2250_v54  ;;  %v2326_v53 = vld [vmem:[%s3275_s6 + $0xe4] ss:$8 sps:$4 sm:$0xff]   ;;  %v2321_v54 = vld [vmem:[%s3275_s6 + $0x1f0] ss:$8 sps:$4 sm:$0xff]  }
  0x32   :  { %2182 = vmatprep.subr.bf16.mxu1 %v2251_v55  ;;  %v2329_v55 = vld [vmem:[%s3275_s6 + $0x1e4] ss:$8 sps:$4 sm:$0xff]  }
  0x34   :  { %2161 = vmatpush3.bf16.msra.mxu0 %v2252_v56  ;;  %v2324_v56 = vld [vmem:[%s3275_s6 + $0xe0] ss:$8 sps:$4 sm:$0xff]  }
  0x35   :  { %2183 = vmatpush3.bf16.msra.mxu1 %v2253_v57  ;;  %2162 = vmatprep.subr.bf16.mxu0 %v2254_v58  ;;  %v2332_v57 = vld [vmem:[%s3275_s6 + $0xd4] ss:$8 sps:$4 sm:$0xff]   ;;  %v2327_v58 = vld [vmem:[%s3275_s6 + $0x1e0] ss:$8 sps:$4 sm:$0xff]  }
  0x36   :  { %2184 = vmatprep.subr.bf16.mxu1 %v2255_v59  ;;  %v2335_v59 = vld [vmem:[%s3275_s6 + $0x1d4] ss:$8 sps:$4 sm:$0xff]  }
  0x38   :  { %2163 = vmatpush3.bf16.msra.mxu0 %v2256_v60  ;;  %v2330_v60 = vld [vmem:[%s3275_s6 + $0xd0] ss:$8 sps:$4 sm:$0xff]  }
  0x39   :  { %2185 = vmatpush3.bf16.msra.mxu1 %v2257_v61  ;;  %2164 = vmatprep.subr.bf16.mxu0 %v2258_v62  ;;  %v2338_v61 = vld [vmem:[%s3275_s6 + $0xc4] ss:$8 sps:$4 sm:$0xff]   ;;  %v2333_v62 = vld [vmem:[%s3275_s6 + $0x1d0] ss:$8 sps:$4 sm:$0xff]  }
  0x3a   :  { %2186 = vmatprep.subr.bf16.mxu1 %v2259_v0  ;;  %v2336_v0 = vld [vmem:[%s3275_s6 + $0xc0] ss:$8 sps:$4 sm:$0xff]  }
  0x3c   :  { %2165 = vmatpush3.bf16.msra.mxu0 %v2260_v2  ;;  %v2339_v2 = vld [vmem:[%s3275_s6 + $0x1c0] ss:$8 sps:$4 sm:$0xff]  }
  0x3d   :  { %2187 = vmatpush3.bf16.msra.mxu1 %v2261_v3  ;;  %2166 = vmatprep.subr.bf16.mxu0 %v2262_v4  ;;  %v2347_v3 = vld [vmem:[%s3275_s6 + $0x1b4] ss:$8 sps:$4 sm:$0xff]   ;;  %v2342_v4 = vld [vmem:[%s3275_s6 + $0xb0] ss:$8 sps:$4 sm:$0xff]  }
  0x3e   :  { %2188 = vmatprep.subr.bf16.mxu1 %v2263_v5  ;;  %v2350_v5 = vld [vmem:[%s3275_s6 + $0xa4] ss:$8 sps:$4 sm:$0xff]  }
  0x40   :  { %2167 = vmatpush3.bf16.msra.mxu0 %v2264_v7  ;;  %v2345_v7 = vld [vmem:[%s3275_s6 + $0x1b0] ss:$8 sps:$4 sm:$0xff]  }
  0x41   :  { %2189 = vmatpush3.bf16.msra.mxu1 %v2265_v9  ;;  %1566 = vmatprep.subr.bf16.mxu0 %v2272_v17  ;;  %v2353_v9 = vld [vmem:[%s3275_s6 + $0x1a4] ss:$8 sps:$4 sm:$0xff]  }
  0x42   :  { %1607 = vmatprep.subr.bf16.mxu1 %v2275_v19  ;;  %v2362_v17 = vld [vmem:[%s3275_s6 + $0x84] ss:$8 sps:$4 sm:$0xff]  }
  0x43   :  { %695 = vmatmul.mubr.bf16.vlgmr.msra.gmra.mxu0 %v1888_v14  ;;  %v2351_v14 = vld [vmem:[%s3275_s6 + $0x1a0] ss:$8 sps:$4 sm:$0xff]   ;;  %v2365_v19 = vld [vmem:[%s3275_s6 + $0x184] ss:$8 sps:$4 sm:$0xff]  }
  0x44   :  { %735 = vmatmul.mubr.bf16.vlgmr.msra.gmra.mxu1 %v1890_v15  ;;  %1567 = vmatpush1.bf16.msra.mxu0 %v2270_v16  ;;  %v2359_v15 = vld [vmem:[%s3275_s6 + $0x194] ss:$8 sps:$4 sm:$0xff]   ;;  %v2354_v16 = vld [vmem:[%s3275_s6 + $0x90] ss:$8 sps:$4 sm:$0xff]  }
  0x45   :  { %1568 = vmatprep.subr.bf16.mxu0 %v2278_v21  ;;  %1608 = vmatpush1.bf16.msra.mxu1 %v2273_v18  ;;  %v2357_v18 = vld [vmem:[%s3275_s6 + $0x190] ss:$8 sps:$4 sm:$0xff]   ;;  %v2368_v21 = vld [vmem:[%s3275_s6 + $0x274] ss:$8 sps:$4 sm:$0xff]  }
  0x46   :  { %1598 = vmatprep.mubr.bf16.mxu0 %v1957_v20  ;;  %1609 = vmatprep.subr.bf16.mxu1 %v2281_v24  ;;  %v2360_v20 = vld [vmem:[%s3275_s6 + $0x80] ss:$8 sps:$4 sm:$0xff]   ;;  %v2371_v24 = vld [vmem:[%s3275_s6 + $0x374] ss:$8 sps:$4 sm:$0xff]  }
  0x47   :  { %1639 = vmatprep.mubr.bf16.mxu1 %v1959_v22  ;;  %v2363_v22 = vld [vmem:[%s3275_s6 + $0x180] ss:$8 sps:$4 sm:$0xff]  }
  0x48   :  { %1569 = vmatpush1.bf16.msra.mxu0 %v2276_v23  ;;  %v1956_v23 = vcombine.low %v2768_v6, %v2768_v6  ;;  %v2369_v6 = vld [vmem:[%s3275_s6 + $0x370] ss:$8 sps:$4 sm:$0xff]  }
  0x49   :  { %1570 = vmatprep.subr.bf16.mxu0 %v2284_v26  ;;  %1610 = vmatpush1.bf16.msra.mxu1 %v2279_v25  ;;  %v2366_v25 = vld [vmem:[%s3275_s6 + $0x270] ss:$8 sps:$4 sm:$0xff]   ;;  %v1958_v26 = vcombine.low %v2774_v8, %v2774_v8  ;;  %v2372_v8 = vld [vmem:[%s3275_s6 + $0x260] ss:$8 sps:$4 sm:$0xff]  }
  0x4a   :  { %1611 = vmatprep.subr.bf16.mxu1 %v2287_v27  ;;  %v2374_v27 = vld [vmem:[%s3275_s6 + $0x264] ss:$8 sps:$4 sm:$0xff]  }
  0x4c   :  { %1571 = vmatpush1.bf16.msra.mxu0 %v2282_v28  ;;  %v2377_v28 = vld [vmem:[%s3275_s6 + $0x364] ss:$8 sps:$4 sm:$0xff]  }
  0x4d   :  { %1572 = vmatprep.subr.bf16.mxu0 %v2290_v29  ;;  %1612 = vmatpush1.bf16.msra.mxu1 %v2285_v30  ;;  %v2380_v29 = vld [vmem:[%s3275_s6 + $0x254] ss:$8 sps:$4 sm:$0xff]   ;;  %v2375_v30 = vld [vmem:[%s3275_s6 + $0x360] ss:$8 sps:$4 sm:$0xff]  }
  0x4e   :  { %1613 = vmatprep.subr.bf16.mxu1 %v2293_v31  ;;  %v2383_v31 = vld [vmem:[%s3275_s6 + $0x354] ss:$8 sps:$4 sm:$0xff]  }
  0x50   :  { %1573 = vmatpush1.bf16.msra.mxu0 %v2288_v32  ;;  %v2378_v32 = vld [vmem:[%s3275_s6 + $0x250] ss:$8 sps:$4 sm:$0xff]  }
  0x51   :  { %1574 = vmatprep.subr.bf16.mxu0 %v2296_v33  ;;  %1614 = vmatpush1.bf16.msra.mxu1 %v2291_v34  ;;  %v2386_v33 = vld [vmem:[%s3275_s6 + $0x244] ss:$8 sps:$4 sm:$0xff]   ;;  %v2381_v34 = vld [vmem:[%s3275_s6 + $0x350] ss:$8 sps:$4 sm:$0xff]  }
  0x52   :  { %1615 = vmatprep.subr.bf16.mxu1 %v2299_v35  ;;  %v2389_v35 = vld [vmem:[%s3275_s6 + $0x344] ss:$8 sps:$4 sm:$0xff]  }
  0x54   :  { %1575 = vmatpush1.bf16.msra.mxu0 %v2294_v36  ;;  %v2384_v36 = vld [vmem:[%s3275_s6 + $0x240] ss:$8 sps:$4 sm:$0xff]  }
  0x55   :  { %1576 = vmatprep.subr.bf16.mxu0 %v2302_v37  ;;  %1616 = vmatpush1.bf16.msra.mxu1 %v2297_v38  ;;  %v2392_v37 = vld [vmem:[%s3275_s6 + $0x234] ss:$8 sps:$4 sm:$0xff]   ;;  %v2387_v38 = vld [vmem:[%s3275_s6 + $0x340] ss:$8 sps:$4 sm:$0xff]  }
  0x56   :  { %1617 = vmatprep.subr.bf16.mxu1 %v2305_v39  ;;  %v2395_v39 = vld [vmem:[%s3275_s6 + $0x334] ss:$8 sps:$4 sm:$0xff]  }
  0x58   :  { %1577 = vmatpush1.bf16.msra.mxu0 %v2300_v40  ;;  %v2390_v40 = vld [vmem:[%s3275_s6 + $0x230] ss:$8 sps:$4 sm:$0xff]  }
  0x59   :  { %1578 = vmatprep.subr.bf16.mxu0 %v2308_v41  ;;  %1618 = vmatpush1.bf16.msra.mxu1 %v2303_v42  ;;  %v2398_v41 = vld [vmem:[%s3275_s6 + $0x224] ss:$8 sps:$4 sm:$0xff]   ;;  %v2393_v42 = vld [vmem:[%s3275_s6 + $0x330] ss:$8 sps:$4 sm:$0xff]  }
  0x5a   :  { %1619 = vmatprep.subr.bf16.mxu1 %v2311_v43  ;;  %v2401_v43 = vld [vmem:[%s3275_s6 + $0x324] ss:$8 sps:$4 sm:$0xff]  }
  0x5c   :  { %1579 = vmatpush1.bf16.msra.mxu0 %v2306_v44  ;;  %v2396_v44 = vld [vmem:[%s3275_s6 + $0x220] ss:$8 sps:$4 sm:$0xff]  }
  0x5d   :  { %1580 = vmatprep.subr.bf16.mxu0 %v2314_v45  ;;  %1620 = vmatpush1.bf16.msra.mxu1 %v2309_v46  ;;  %v2404_v45 = vld [vmem:[%s3275_s6 + $0x214] ss:$8 sps:$4 sm:$0xff]  }
  0x5e   :  { %1621 = vmatprep.subr.bf16.mxu1 %v2317_v47  ;;  %v748_v46 = vld [vmem:[%s3270_s1 + $0x10] sm:$0xff]  ;;  %v749_v47 = vld [vmem:[%s3270_s1 + $0x18] sm:$0xff] }
  0x60   :  { %1581 = vmatpush1.bf16.msra.mxu0 %v2312_v48  ;;  %v2399_v48 = vld [vmem:[%s3275_s6 + $0x320] ss:$8 sps:$4 sm:$0xff]  }
  0x61   :  { %1582 = vmatprep.subr.bf16.mxu0 %v2320_v49  ;;  %1622 = vmatpush1.bf16.msra.mxu1 %v2315_v50  ;;  %v3079_v49 = vmul.bf16 %v748_v46, %v2782_v10  ;;  %v3082_v50 = vmul.bf16 %v749_v47, %v2787_v11  ;;  %v2410_v11 = vld [vmem:[%s3275_s6 + $0x204] ss:$8 sps:$4 sm:$0xff]  }
  0x62   :  { %1623 = vmatprep.subr.bf16.mxu1 %v2323_v51  ;;  %v2407_v51 = vld [vmem:[%s3275_s6 + $0x314] ss:$8 sps:$4 sm:$0xff]  }
  0x63   :  { %v1963_v10 = vcombine.high %v3082_v50, %v3082_v50 }
  0x64   :  { %1583 = vmatpush2.bf16.msra.mxu0 %v2318_v52  ;;  %v2402_v52 = vld [vmem:[%s3275_s6 + $0x210] ss:$8 sps:$4 sm:$0xff]  }
  0x65   :  { %1584 = vmatprep.subr.bf16.mxu0 %v2326_v53  ;;  %1624 = vmatpush2.bf16.msra.mxu1 %v2321_v54  ;;  %v1961_v53 = vcombine.high %v3079_v49, %v3079_v49  ;;  %v2405_v54 = vld [vmem:[%s3275_s6 + $0x310] ss:$8 sps:$4 sm:$0xff]  }
  0x66   :  { %1625 = vmatprep.subr.bf16.mxu1 %v2329_v55  ;;  %v2413_v55 = vld [vmem:[%s3275_s6 + $0x304] ss:$8 sps:$4 sm:$0xff]  }
  0x68   :  { %1585 = vmatpush2.bf16.msra.mxu0 %v2324_v56  ;;  %v2408_v56 = vld [vmem:[%s3275_s6 + $0x200] ss:$8 sps:$4 sm:$0xff]  }
  0x69   :  { %1586 = vmatprep.subr.bf16.mxu0 %v2332_v57  ;;  %1626 = vmatpush2.bf16.msra.mxu1 %v2327_v58  ;;  %v2416_v57 = vld [vmem:[%s3275_s6 + $0x2f4] ss:$8 sps:$4 sm:$0xff]   ;;  %v2411_v58 = vld [vmem:[%s3275_s6 + $0x300] ss:$8 sps:$4 sm:$0xff]  }
  0x6a   :  { %1627 = vmatprep.subr.bf16.mxu1 %v2335_v59  ;;  %v2419_v59 = vld [vmem:[%s3275_s6 + $0x3f4] ss:$8 sps:$4 sm:$0xff]  }
  0x6c   :  { %1587 = vmatpush2.bf16.msra.mxu0 %v2330_v60  ;;  %v2414_v60 = vld [vmem:[%s3275_s6 + $0x2f0] ss:$8 sps:$4 sm:$0xff]  }
  0x6d   :  { %1588 = vmatprep.subr.bf16.mxu0 %v2338_v61  ;;  %1628 = vmatpush2.bf16.msra.mxu1 %v2333_v62  ;;  %v2422_v61 = vld [vmem:[%s3275_s6 + $0x2e4] ss:$8 sps:$4 sm:$0xff]  }
  0x6e   :  { %1629 = vmatprep.subr.bf16.mxu1 %v2341_v63 }
  0x70   :  { %1589 = vmatpush2.bf16.msra.mxu0 %v2336_v0 }
  0x71   :  { %1590 = vmatprep.subr.bf16.mxu0 %v2344_v1  ;;  %1630 = vmatpush2.bf16.msra.mxu1 %v2339_v2 }
  0x72   :  { %1631 = vmatprep.subr.bf16.mxu1 %v2347_v3 }
  0x74   :  { %1591 = vmatpush2.bf16.msra.mxu0 %v2342_v4 }
  0x75   :  { %1592 = vmatprep.subr.bf16.mxu0 %v2350_v5  ;;  %1632 = vmatpush2.bf16.msra.mxu1 %v2345_v7 }
  0x76   :  { %1633 = vmatprep.subr.bf16.mxu1 %v2353_v9 }
  0x78   :  { %1593 = vmatpush2.bf16.msra.mxu0 %v2348_v12 }
  0x79   :  { %1594 = vmatprep.subr.bf16.mxu0 %v2356_v13  ;;  %1634 = vmatpush2.bf16.msra.mxu1 %v2351_v14 }
  0x7a   :  { %1635 = vmatprep.subr.bf16.mxu1 %v2359_v15 }
  0x7c   :  { %1595 = vmatpush2.bf16.msra.mxu0 %v2354_v16 }
  0x7d   :  { %1596 = vmatprep.subr.bf16.mxu0 %v2362_v17  ;;  %1636 = vmatpush2.bf16.msra.mxu1 %v2357_v18 }
  0x7e   :  { %1637 = vmatprep.subr.bf16.mxu1 %v2365_v19 }
  0x80   :  { %1597 = vmatpush2.bf16.msra.mxu0 %v2360_v20 }
  0x81   :  { %1648 = vmatprep.subr.bf16.mxu0 %v2368_v21  ;;  %1638 = vmatpush2.bf16.msra.mxu1 %v2363_v22 }
  0x82   :  { %1689 = vmatprep.subr.bf16.mxu1 %v2371_v24 }
  0x83   :  { %1599 = vmatmul.mubr.bf16.vlgmr.msra.gmra.mxu0 %v1956_v23 }
  0x84   :  { %1649 = vmatpush1.bf16.msra.mxu0 %v2366_v25  ;;  %1640 = vmatmul.mubr.bf16.vlgmr.msra.gmra.mxu1 %v1958_v26 }
  0x85   :  { %1650 = vmatprep.subr.bf16.mxu0 %v2374_v27  ;;  %1690 = vmatpush1.bf16.msra.mxu1 %v2369_v6 }
  0x86   :  { %1691 = vmatprep.subr.bf16.mxu1 %v2377_v28  ;;  %1680 = vmatprep.mubr.bf16.mxu0 %v1961_v53 }
  0x87   :  { %1721 = vmatprep.mubr.bf16.mxu1 %v1963_v10 }
  0x88   :  { %1651 = vmatpush1.bf16.msra.mxu0 %v2372_v8 }
  0x89   :  { %1652 = vmatprep.subr.bf16.mxu0 %v2380_v29  ;;  %1692 = vmatpush1.bf16.msra.mxu1 %v2375_v30 }
  0x8a   :  { %1693 = vmatprep.subr.bf16.mxu1 %v2383_v31 }
  0x8c   :  { %1653 = vmatpush1.bf16.msra.mxu0 %v2378_v32 }
  0x8d   :  { %1654 = vmatprep.subr.bf16.mxu0 %v2386_v33  ;;  %1694 = vmatpush1.bf16.msra.mxu1 %v2381_v34 }
  0x8e   :  { %1695 = vmatprep.subr.bf16.mxu1 %v2389_v35 }
  0x90   :  { %1655 = vmatpush1.bf16.msra.mxu0 %v2384_v36 }
  0x91   :  { %1656 = vmatprep.subr.bf16.mxu0 %v2392_v37  ;;  %1696 = vmatpush1.bf16.msra.mxu1 %v2387_v38 }
  0x92   :  { %1697 = vmatprep.subr.bf16.mxu1 %v2395_v39 }
  0x94   :  { %1657 = vmatpush1.bf16.msra.mxu0 %v2390_v40 }
  0x95   :  { %1658 = vmatprep.subr.bf16.mxu0 %v2398_v41  ;;  %1698 = vmatpush1.bf16.msra.mxu1 %v2393_v42 }
  0x96   :  { %1699 = vmatprep.subr.bf16.mxu1 %v2401_v43 }
  0x98   :  { %1659 = vmatpush1.bf16.msra.mxu0 %v2396_v44 }
  0x99   :  { %1660 = vmatprep.subr.bf16.mxu0 %v2404_v45  ;;  %1700 = vmatpush1.bf16.msra.mxu1 %v2399_v48 }
  0x9a   :  { %1701 = vmatprep.subr.bf16.mxu1 %v2407_v51 }
  0x9c   :  { %1661 = vmatpush1.bf16.msra.mxu0 %v2402_v52 }
  0x9d   :  { %1662 = vmatprep.subr.bf16.mxu0 %v2410_v11  ;;  %1702 = vmatpush1.bf16.msra.mxu1 %v2405_v54 }
  0x9e   :  { %1703 = vmatprep.subr.bf16.mxu1 %v2413_v55 }
  0xa0   :  { %1663 = vmatpush1.bf16.msra.mxu0 %v2408_v56 }
  0xa1   :  { %1664 = vmatprep.subr.bf16.mxu0 %v2416_v57 }
  0xa2   :  { %13 = vsyncpa [#allocation3], 0  ;;  %1704 = vmatpush1.bf16.msra.mxu1 %v2411_v58  ;;  %v2417_v62 = vld [vmem:[%s3275_s6 + $0x3f0] ss:$8 sps:$4 sm:$0xff]   ;;  %v2425_v63 = vld [vmem:[%s3275_s6 + $0x3e4] ss:$8 sps:$4 sm:$0xff]   ;;  %v1960_v29 = vcombine.low %v3079_v49, %v3079_v49  ;;  %v1962_v31 = vcombine.low %v3082_v50, %v3082_v50 }
  0xa3   :  { %1705 = vmatprep.subr.bf16.mxu1 %v2419_v59  ;;  %v2420_v0 = vld [vmem:[%s3275_s6 + $0x2e0] ss:$8 sps:$4 sm:$0xff]   ;;  %v2428_v1 = vld [vmem:[%s3275_s6 + $0x2d4] ss:$8 sps:$4 sm:$0xff]   ;;  %v2426_v4 = vld [vmem:[%s3275_s6 + $0x2d0] ss:$8 sps:$4 sm:$0xff]  }
  0xa4   :  { %1665 = vmatpush2.bf16.msra.mxu0 %v2414_v60  ;;  %v2423_v2 = vld [vmem:[%s3275_s6 + $0x3e0] ss:$8 sps:$4 sm:$0xff]   ;;  %v2431_v3 = vld [vmem:[%s3275_s6 + $0x3d4] ss:$8 sps:$4 sm:$0xff]   ;;  %v2434_v5 = vld [vmem:[%s3275_s6 + $0x2c4] ss:$8 sps:$4 sm:$0xff]  }
  0xa5   :  { %1666 = vmatprep.subr.bf16.mxu0 %v2422_v61  ;;  %v2429_v7 = vld [vmem:[%s3275_s6 + $0x3d0] ss:$8 sps:$4 sm:$0xff]   ;;  %v2437_v9 = vld [vmem:[%s3275_s6 + $0x3c4] ss:$8 sps:$4 sm:$0xff]   ;;  %v2432_v12 = vld [vmem:[%s3275_s6 + $0x2c0] ss:$8 sps:$4 sm:$0xff]  }
  0xa6   :  { %1706 = vmatpush2.bf16.msra.mxu1 %v2417_v62  ;;  %v2440_v13 = vld [vmem:[%s3275_s6 + $0x2b4] ss:$8 sps:$4 sm:$0xff]   ;;  %v2435_v14 = vld [vmem:[%s3275_s6 + $0x3c0] ss:$8 sps:$4 sm:$0xff]   ;;  %v2438_v16 = vld [vmem:[%s3275_s6 + $0x2b0] ss:$8 sps:$4 sm:$0xff]  }
  0xa7   :  { %1707 = vmatprep.subr.bf16.mxu1 %v2425_v63  ;;  %v2443_v15 = vld [vmem:[%s3275_s6 + $0x3b4] ss:$8 sps:$4 sm:$0xff]   ;;  %v2446_v17 = vld [vmem:[%s3275_s6 + $0x2a4] ss:$8 sps:$4 sm:$0xff]   ;;  %v2441_v18 = vld [vmem:[%s3275_s6 + $0x3b0] ss:$8 sps:$4 sm:$0xff]  }
  0xa8   :  { %1667 = vmatpush2.bf16.msra.mxu0 %v2420_v0  ;;  %v2449_v19 = vld [vmem:[%s3275_s6 + $0x3a4] ss:$8 sps:$4 sm:$0xff]   ;;  %v2444_v20 = vld [vmem:[%s3275_s6 + $0x2a0] ss:$8 sps:$4 sm:$0xff]   ;;  %v2452_v21 = vld [vmem:[%s3275_s6 + $0x294] ss:$8 sps:$4 sm:$0xff]  }
  0xa9   :  { %1668 = vmatprep.subr.bf16.mxu0 %v2428_v1  ;;  %v2447_v22 = vld [vmem:[%s3275_s6 + $0x3a0] ss:$8 sps:$4 sm:$0xff]   ;;  %v2455_v23 = vld [vmem:[%s3275_s6 + $0x394] ss:$8 sps:$4 sm:$0xff]   ;;  %v2450_v24 = vld [vmem:[%s3275_s6 + $0x290] ss:$8 sps:$4 sm:$0xff]  }
  0xaa   :  { %1708 = vmatpush2.bf16.msra.mxu1 %v2423_v2  ;;  %v2458_v25 = vld [vmem:[%s3275_s6 + $0x284] ss:$8 sps:$4 sm:$0xff]   ;;  %v2453_v26 = vld [vmem:[%s3275_s6 + $0x390] ss:$8 sps:$4 sm:$0xff]   ;;  %v2456_v6 = vld [vmem:[%s3275_s6 + $0x280] ss:$8 sps:$4 sm:$0xff]  }
  0xab   :  { %1709 = vmatprep.subr.bf16.mxu1 %v2431_v3  ;;  %v2461_v27 = vld [vmem:[%s3275_s6 + $0x384] ss:$8 sps:$4 sm:$0xff]   ;;  %v2464_v28 = vld [vmem:[%s3274_s5 + $0x74] ss:$8 sps:$4 sm:$0xff]   ;;  %v2459_v8 = vld [vmem:[%s3275_s6 + $0x380] ss:$8 sps:$4 sm:$0xff]  }
  0xac   :  { %1669 = vmatpush2.bf16.msra.mxu0 %v2426_v4  ;;  %v2462_v30 = vld [vmem:[%s3274_s5 + $0x70] ss:$8 sps:$4 sm:$0xff]   ;;  %v2467_v32 = vld [vmem:[%s3274_s5 + $0x64] ss:$8 sps:$4 sm:$0xff]   ;;  %v2465_v33 = vld [vmem:[%s3274_s5 + $0x60] ss:$8 sps:$4 sm:$0xff]  }
  0xad   :  { %1670 = vmatprep.subr.bf16.mxu0 %v2434_v5  ;;  %v2510_v34 = vmov 0   ;;  %v2470_v35 = vld [vmem:[%s3274_s5 + $0x54] ss:$8 sps:$4 sm:$0xff]   ;;  %v2468_v36 = vld [vmem:[%s3274_s5 + $0x50] ss:$8 sps:$4 sm:$0xff]   ;;  %s2511_s3 = smov [#allocation2]  }
  0xae   :  { %1710 = vmatpush2.bf16.msra.mxu1 %v2429_v7  ;;  %v2473_v37 = vld [vmem:[%s3274_s5 + $0x44] ss:$8 sps:$4 sm:$0xff]   ;;  %v2471_v38 = vld [vmem:[%s3274_s5 + $0x40] ss:$8 sps:$4 sm:$0xff]   ;;  %v2476_v39 = vld [vmem:[%s3274_s5 + $0x34] ss:$8 sps:$4 sm:$0xff]  }
  0xaf   :  { %1711 = vmatprep.subr.bf16.mxu1 %v2437_v9  ;;  %v2474_v40 = vld [vmem:[%s3274_s5 + $0x30] ss:$8 sps:$4 sm:$0xff]   ;;  %v2479_v41 = vld [vmem:[%s3274_s5 + $0x24] ss:$8 sps:$4 sm:$0xff]   ;;  %v2477_v42 = vld [vmem:[%s3274_s5 + $0x20] ss:$8 sps:$4 sm:$0xff]  }
  0xb0   :  { %1671 = vmatpush2.bf16.msra.mxu0 %v2432_v12  ;;  %v2482_v43 = vld [vmem:[%s3274_s5 + $0x14] ss:$8 sps:$4 sm:$0xff]   ;;  %v2480_v44 = vld [vmem:[%s3274_s5 + $0x10] ss:$8 sps:$4 sm:$0xff]   ;;  %v2485_v45 = vld [vmem:[%s3274_s5 + $0x4] ss:$8 sps:$4 sm:$0xff]  }
  0xb1   :  { %1672 = vmatprep.subr.bf16.mxu0 %v2440_v13  ;;  %v2483_v46 = vld [vmem:[%s3274_s5] ss:$8 sps:$4 sm:$0xff]   ;;  %s1875_s13 = sshll.u32 %s2511_s3, 4  ;;  %s1876_s13 = int_to_ptr.vmem [resolvable:$true] %s1875_s13 }
  0xb2   :  { %1712 = vmatpush2.bf16.msra.mxu1 %v2435_v14  ;;  %v1883_v54 = vld [vmem:[%s3273_s4] ss:$0 sm:$0xff]  ;;  %s2488_s0 = scalar_lea.vmem %s1876_s13, 256  ;;  %p2493_p1 = scmp.lt.s32.totalorder %s1876_s13, %s1876_s13 }
  0xb3   :  { %1713 = vmatprep.subr.bf16.mxu1 %v2443_v15  ;;  %v744_v9 = vld [vmem:[%s3271_s2] sm:$0xf]  ;;  %p2489_p0 = scmp.ne.s32.totalorder %s1876_s13, %s2488_s0  ;;  %p2494_p2 = scmp.lt.s32.totalorder %s2488_s0, %s2488_s0 }
  0xb4   :  { %1673 = vmatpush2.bf16.msra.mxu0 %v2438_v16 }
  0xb5   :  { %1674 = vmatprep.subr.bf16.mxu0 %v2446_v17  ;;  %p2495_p3 = por %p2494_p2, %p2493_p1 }
  0xb6   :  { %1714 = vmatpush2.bf16.msra.mxu1 %v2441_v18 }
  0xb7   :  { %1715 = vmatprep.subr.bf16.mxu1 %v2449_v19  ;;  %p2496_p4 = pnand %p2495_p3, %p2489_p0 }
  0xb8   :  { %1675 = vmatpush2.bf16.msra.mxu0 %v2444_v20 }
  0xb9   :  { %1676 = vmatprep.subr.bf16.mxu0 %v2452_v21 }
  0xba   :  { %1716 = vmatpush2.bf16.msra.mxu1 %v2447_v22 }
  0xbb   :  { %1717 = vmatprep.subr.bf16.mxu1 %v2455_v23 }
  0xbc   :  { %1677 = vmatpush2.bf16.msra.mxu0 %v2450_v24 }
  0xbd   :  { %1678 = vmatprep.subr.bf16.mxu0 %v2458_v25 }
  0xbe   :  { %1718 = vmatpush2.bf16.msra.mxu1 %v2453_v26 }
  0xbf   :  { %1719 = vmatprep.subr.bf16.mxu1 %v2461_v27 }
  0xc0   :  { %1679 = vmatpush2.bf16.msra.mxu0 %v2456_v6 }
  0xc1   :  { %1810 = vmatprep.subr.bf16.mxu0 %v2464_v28 }
  0xc2   :  { %1720 = vmatpush2.bf16.msra.mxu1 %v2459_v8 }
  0xc3   :  { %1681 = vmatmul.mubr.bf16.vlgmr.msra.gmra.mxu0 %v1960_v29 }
  0xc4   :  { %1811 = vmatpush1.bf16.msra.mxu0 %v2462_v30  ;;  %1842 = vmatprep.mubr.bf16.mxu0 %v2510_v34  ;;  %v1855_v34 = vlaneseq }
  0xc5   :  { %1722 = vmatmul.mubr.bf16.vlgmr.msra.gmra.mxu1 %v1962_v31  ;;  %1812 = vmatprep.subr.bf16.mxu0 %v2467_v32 }
  0xc8   :  { %1813 = vmatpush1.bf16.msra.mxu0 %v2465_v33 }
  0xc9   :  { %1814 = vmatprep.subr.bf16.mxu0 %v2470_v35  ;;  %v1856_v35 = vshrl.u32 %v1855_v34, 7 }
  0xcc   :  { %1815 = vmatpush1.bf16.msra.mxu0 %v2468_v36  ;;  %v1857_v36 = vsub.s32 0, %v1856_v35 }
  0xcd   :  { %1816 = vmatprep.subr.bf16.mxu0 %v2473_v37  ;;  %v1853_v37 = vld [vmem:[%s3276_s7] sm:$0x3] }
  0xd0   :  { %1817 = vmatpush1.bf16.msra.mxu0 %v2471_v38  ;;  %v1861_v38 = vsub.s32 1, %v1856_v35 }
  0xd1   :  { %1818 = vmatprep.subr.bf16.mxu0 %v2476_v39 }
  0xd4   :  { %1819 = vmatpush1.bf16.msra.mxu0 %v2474_v40 }
  0xd5   :  { %1820 = vmatprep.subr.bf16.mxu0 %v2479_v41  ;;  %v1858_v41 = vrot.slane %v1853_v37, %v1857_v36 }
  0xd8   :  { %1821 = vmatpush1.bf16.msra.mxu0 %v2477_v42 }
  0xd9   :  { %1822 = vmatprep.subr.bf16.mxu0 %v2482_v43 }
  0xdc   :  { %1823 = vmatpush1.bf16.msra.mxu0 %v2480_v44 }
  0xdd   :  { %1824 = vmatprep.subr.bf16.mxu0 %v2485_v45  ;;  %v1862_v45 = vrot.slane %v1853_v37, %v1861_v38 }
  0xe0   :  { %1825 = vmatpush1.bf16.msra.mxu0 %v2483_v46 }
  0xe3   :  { %v2124_v47 = vpop.f32.mrf.mxu0 }
  0xe4   :  { %v2146_v48 = vpop.f32.mrf.mxu1 }
  0xe5   :  { %v2125_v49 = vpop.f32.mrf.mxu0 }
  0xe6   :  { %v2147_v50 = vpop.f32.mrf.mxu1  ;;  %v2126_v11 = vadd.f32 %v2125_v49, %v2124_v47 }
  0xe7   :  { %v2127_v51 = vpop.f32.mrf.mxu0  ;;  %v2148_v56 = vadd.f32 %v2147_v50, %v2146_v48 }
  0xe8   :  { %v2149_v52 = vpop.f32.mrf.mxu1  ;;  %v617_v55 = vadd.f32 %v2126_v11, %v1883_v54 }
  0xe9   :  { %v2128_v53 = vpop.f32.mrf.mxu0 }
  0xea   :  { %v2150_v10 = vpop.f32.mrf.mxu1  ;;  %v657_v60 = vadd.f32 %v2148_v56, %v617_v55 }
 0x103   :  { %v2168_v57 = vpop.f32.mrf.mxu0 }
 0x104   :  { %v2190_v58 = vpop.f32.mrf.mxu1 }
 0x105   :  { %v2169_v59 = vpop.f32.mrf.mxu0 }
 0x106   :  { %v2170_v61 = vadd.f32 %v2169_v59, %v2168_v57  ;;  %v2191_v62 = vpop.f32.mrf.mxu1 }
 0x107   :  { %v2171_v63 = vpop.f32.mrf.mxu0  ;;  %v2192_v1 = vadd.f32 %v2191_v62, %v2190_v58 }
 0x108   :  { %v697_v0 = vadd.f32 %v2170_v61, %v657_v60  ;;  %v2193_v2 = vpop.f32.mrf.mxu1 }
 0x109   :  { %v2172_v3 = vpop.f32.mrf.mxu0 }
 0x10a   :  { %v737_v4 = vadd.f32 %v2192_v1, %v697_v0  ;;  %v2194_v5 = vpop.f32.mrf.mxu1 }
 0x10c   :  { %2486 = vtanh.f32 %v737_v4 }
 0x119   :  { %v2487_v7 = vpop.eup %2486 }
 0x11a   :  { %v743_v12 = vpack.c.bf16 %v2487_v7, %v2487_v7 }
 0x11c   :  { %v745_v13 = vmul.bf16 %v744_v9, %v743_v12 }
 0x11e   :  { %1843 = vmatmul.mubr.bf16.vlgmr.msra.gmra.mxu0 %v745_v13 }
 0x143   :  { %v1600_v14 = vpop.f32.mrf.mxu0 }
 0x144   :  { %v1641_v16 = vpop.f32.mrf.mxu1 }
 0x145   :  { %v1602_v15 = vpop.f32.mrf.mxu0  ;;  %v1642_v17 = vadd.f32 %v1641_v16, %v1600_v14 }
 0x146   :  { %v1643_v19 = vpop.f32.mrf.mxu1 }
 0x147   :  { %v1604_v18 = vpop.f32.mrf.mxu0  ;;  %v1644_v20 = vadd.f32 %v1643_v19, %v1602_v15 }
 0x148   :  { %v1645_v22 = vpop.f32.mrf.mxu1 }
 0x149   :  { %v1605_v21 = vpop.f32.mrf.mxu0 }
 0x14a   :  { %v1646_v23 = vpop.f32.mrf.mxu1 }
 0x183   :  { %v1682_v24 = vpop.f32.mrf.mxu0 }
 0x184   :  { %v1683_v25 = vadd.f32 %v1682_v24, %v1642_v17 }
 0x185   :  { %v1684_v26 = vpop.f32.mrf.mxu0  ;;  %v1723_v27 = vpop.f32.mrf.mxu1 }
 0x186   :  { %v1685_v6 = vadd.f32 %v1684_v26, %v1644_v20  ;;  %v1724_v28 = vadd.f32 %v1723_v27, %v1683_v25 }
 0x187   :  { %v1725_v8 = vpop.f32.mrf.mxu1  ;;  %v1686_v29 = vpop.f32.mrf.mxu0 }
 0x188   :  { %v1726_v30 = vadd.f32 %v1725_v8, %v1685_v6 }
 0x189   :  { %v1687_v31 = vpop.f32.mrf.mxu0  ;;  %v1727_v32 = vpop.f32.mrf.mxu1 }
 0x18b   :  { %v1728_v33 = vpop.f32.mrf.mxu1 }
 0x1de   :  { %v1844_v39 = vpop.f32.mrf.mxu0 }
 0x1df   :  { %v1845_v40 = vadd.f32 %v1844_v39, %v1724_v28 }
 0x1e0   :  { %v1846_v42 = vpop.f32.mrf.mxu0 }
 0x1e1   :  { %v1851_v43 = vmul.f32 2.0, %v1845_v40  ;;  %v1847_v44 = vadd.f32 %v1846_v42, %v1726_v30 }
 0x1e2   :  { %v1848_v46 = vpop.f32.mrf.mxu0 }
 0x1e3   :  { %v1865_v47 = vadd.f32 %v1858_v41, %v1851_v43  ;;  %v1852_v48 = vmul.f32 2.0, %v1847_v44 }
 0x1e4   :  { %v1849_v49 = vpop.f32.mrf.mxu0 }
 0x1e5   :  { %1867 = vst [vmem:[#allocation2] sm:$0xff] %v1865_v47  ;;  %v1866_v50 = vadd.f32 %v1862_v45, %v1852_v48 }
 0x1e7   :  { %1868 = vst [vmem:[#allocation2 + $0x8] sm:$0xff] %v1866_v50 }
 0x1e8   :  { %2499 = shalt.err (!%p2496_p4)
}
 0x1e9   :  { %1878 = dma.vmem_to_hbm [thread:$0]  %s1876_s13, 256, %s3277_s8, [#allocation3]  }
 0x1ea   :  { %2508 = dma.done.wait [#allocation3], 256  }
 0x1eb   :  { %2509 = vsyncadd [#allocation3], 4294967040 }
 0x1ec   :  { %1882 = vsyncpa [#allocation3], 1 }

</bundles_post_ra>
